<compile_context>
chip_gen: v7x
topology: tpu7x:2x2x1
jax: 0.10.0
libtpu: 0.0.40
codegen_flags: <defaults>
</compile_context>

<pallas_src>
import jax
import jax.numpy as jnp
import numpy as np
from jax.experimental import pallas as pl
from jax.experimental.pallas import tpu as pltpu

_VMEM_LIMIT = 32 * 1024 * 1024       # safe scoped-VMEM limit on v5e / v6e / v7x
_A_TILE_BUDGET = 12 * 1024 * 1024    # budget for the double-buffered A row-tiles
_STEP_PACK_BUDGET = 4 * 1024 * 1024  # pack small batch elements up to this per-step size


def _gcn_kernel_with_w(feat_ref, a_ref, w_ref, shift_ref, o_ref):
    # y = relu( (A_tile @ x) @ W' + shift' ); 2-D MXU dots, static unroll over packed batch.
    w = w_ref[...]          # (F_in, Fp)
    shift = shift_ref[...]  # (1, Fp)
    for i in range(a_ref.shape[0]):
        h = jnp.dot(a_ref[i], feat_ref[i], preferred_element_type=jnp.float32)   # (TN, F_in)
        z = jnp.dot(h, w, preferred_element_type=jnp.float32) + shift            # (TN, Fp)
        o_ref[i] = jnp.maximum(z, 0.0).astype(o_ref.dtype)


def _gcn_kernel_prop_only(feat_ref, a_ref, shift_ref, o_ref):
    # features already hold x @ W'; y = relu( A_tile @ feat + shift' )
    shift = shift_ref[...]  # (1, Fp)
    for i in range(a_ref.shape[0]):
        z = jnp.dot(a_ref[i], feat_ref[i], preferred_element_type=jnp.float32) + shift
        o_ref[i] = jnp.maximum(z, 0.0).astype(o_ref.dtype)


def gcn_layer(x, A, W, bias, gamma, beta, running_mean, running_var,
              eps=1e-5, matmul_dtype=None):
    B, N, F_in = x.shape
    F_out = W.shape[1]
    out_dtype = x.dtype

    # ---- fold Linear bias + BatchNorm (eval) into (W', shift') once, in the wrapper ----
    inv_std = 1.0 / jnp.sqrt(running_var.astype(jnp.float32) + eps)
    scale = gamma.astype(jnp.float32) * inv_std                                    # (F_out,)
    Wp = W.astype(jnp.float32) * scale[None, :]                                    # (F_in, F_out)
    shift = (bias.astype(jnp.float32) * scale
             + beta.astype(jnp.float32) - running_mean.astype(jnp.float32) * scale)

    # ---- lane-dense output: pad F_out up to a multiple of 128 ----
    Fp = ((F_out + 127) // 128) * 128
    if Fp != F_out:
        Wp = jnp.pad(Wp, ((0, 0), (0, Fp - F_out)))
        shift = jnp.pad(shift, (0, Fp - F_out))
    shift2d = shift.reshape(1, Fp)

    # ---- matmul order: put the narrower feature width on the O(N^2) contraction ----
    apply_w_in_kernel = F_in <= Fp
    if apply_w_in_kernel:
        feat = x                                                       # (B, N, F_in)
        f_mid = F_in
    else:
        # padded F_out < F_in: shrink features once, kernel then does A @ (x @ W')
        feat = jnp.einsum("bnf,fo->bno", x.astype(jnp.float32), Wp)    # (B, N, Fp)
        f_mid = Fp

    mm_dtype = matmul_dtype if matmul_dtype is not None else feat.dtype
    feat = feat.astype(mm_dtype)
    A_in = A.astype(mm_dtype)
    elem = jnp.dtype(mm_dtype).itemsize
    out_elem = jnp.dtype(out_dtype).itemsize

    # ---- tile the node dimension so the (dominant) A stream stays within VMEM budget ----
    if N <= 512:
        tn = N                                                   # full dim: always legal
    else:
        tn = min(512, max(8, (_A_TILE_BUDGET // (2 * N * elem)) // 8 * 8))
    n_tiles = pl.cdiv(N, tn)

    # ---- pack several batch elements per grid step when the problem is tiny ----
    def step_bytes(bt):
        return (2 * bt * tn * N * elem            # A tiles (double-buffered)
                + 2 * bt * N * f_mid * elem       # resident features
                + 2 * bt * tn * Fp * out_elem     # output tiles
                + 2 * (F_in * Fp + Fp) * 4)       # W' + shift
    bt = 1
    while bt < min(B, 8) and B % (2 * bt) == 0 and step_bytes(2 * bt) <= _STEP_PACK_BUDGET:
        bt *= 2

    assert step_bytes(bt) < _VMEM_LIMIT, (
        f"GCN Pallas kernel working set {step_bytes(bt)} B exceeds {_VMEM_LIMIT} B; "
        "shrink TILE_N or also tile the contraction dimension.")

    in_specs = [
        pl.BlockSpec((bt, N, f_mid), lambda b, n: (b, 0, 0)),    # features (resident across n)
        pl.BlockSpec((bt, tn, N), lambda b, n: (b, n, 0)),       # A row-tile
    ]
    operands = [feat, A_in]
    if apply_w_in_kernel:
        in_specs.append(pl.BlockSpec((F_in, Fp), lambda b, n: (0, 0)))
        operands.append(Wp)
        kernel = _gcn_kernel_with_w
    else:
        kernel = _gcn_kernel_prop_only
    in_specs.append(pl.BlockSpec((1, Fp), lambda b, n: (0, 0)))
    operands.append(shift2d)

    flops = 2 * B * N * N * f_mid + (2 * B * N * F_in * Fp if apply_w_in_kernel else 0)
    bytes_accessed = (A_in.size * elem + feat.size * elem + Wp.size * 4
                      + B * N * Fp * out_elem)
    cost = pl.CostEstimate(flops=int(flops), transcendentals=0,
                           bytes_accessed=int(bytes_accessed))

    y_pad = pl.pallas_call(
        kernel,
        out_shape=jax.ShapeDtypeStruct((B, N, Fp), out_dtype),
        grid_spec=pltpu.PrefetchScalarGridSpec(
            num_scalar_prefetch=0,
            grid=(B // bt, n_tiles),
            in_specs=in_specs,
            out_specs=pl.BlockSpec((bt, tn, Fp), lambda b, n: (b, n, 0)),
        ),
        compiler_params=pltpu.CompilerParams(
            dimension_semantics=("parallel", "parallel"),
            vmem_limit_bytes=_VMEM_LIMIT,
        ),
        cost_estimate=cost,
    )(*operands)

    y = y_pad[:, :, :F_out] if Fp != F_out else y_pad
    return y, A


def _reference(x, A, W, bias, gamma, beta, rm, rv, eps=1e-5):
    h = jnp.einsum("bnm,bmf->bnf", A, x)
    z = jnp.einsum("bnf,fo->bno", h, W) + bias
    bn = gamma * (z - rm) / jnp.sqrt(rv + eps) + beta
    return jnp.maximum(bn, 0.0)


if __name__ == "__main__":
    def run_case(key, B, N, F_in, F_out):
        kx, ka, kw, kb, kg, kbe, krm, krv = jax.random.split(key, 8)
        x = jax.random.normal(kx, (B, N, F_in), dtype=jnp.float32)
        A = jax.random.uniform(ka, (B, N, N), dtype=jnp.float32)
        bound = 1.0 / np.sqrt(F_in)
        W = jax.random.uniform(kw, (F_in, F_out), minval=-bound, maxval=bound, dtype=jnp.float32)
        bias = jax.random.uniform(kb, (F_out,), minval=-bound, maxval=bound, dtype=jnp.float32)
        gamma = 1.0 + 0.1 * jax.random.normal(kg, (F_out,), dtype=jnp.float32)
        beta = 0.1 * jax.random.normal(kbe, (F_out,), dtype=jnp.float32)
        rm = 0.05 * jax.random.normal(krm, (F_out,), dtype=jnp.float32)
        rv = 1.0 + 0.1 * jax.random.uniform(krv, (F_out,), dtype=jnp.float32)

        y, A_out = gcn_layer(x, A, W, bias, gamma, beta, rm, rv)
        y = jax.block_until_ready(y)

        y_ref = _reference(x, A, W, bias, gamma, beta, rm, rv)
        np.testing.assert_allclose(np.asarray(y), np.asarray(y_ref), rtol=1e-4, atol=1e-5)
        assert A_out.shape == A.shape

    key0 = jax.random.PRNGKey(0)
    run_case(key0, B=2, N=16, F_in=8, F_out=32)                       # (A @ x) @ W' path
    run_case(jax.random.fold_in(key0, 1), B=2, N=16, F_in=256, F_out=32)  # A @ (x @ W') path
    print("KERNEL_OK")
</pallas_src>

<mosaic_0001>
module attributes {stable_mosaic.version = 11 : i64} {
  func.func @_gcn_kernel_with_w(%arg0: i32, %arg1: i32, %arg2: memref<2x16x8xf32, #tpu.memory_space<vmem>>, %arg3: memref<2x16x16xf32, #tpu.memory_space<vmem>>, %arg4: memref<8x128xf32, #tpu.memory_space<vmem>>, %arg5: memref<1x128xf32, #tpu.memory_space<vmem>>, %arg6: memref<2x16x128xf32, #tpu.memory_space<vmem>>) attributes {dimension_semantics = [#tpu.dimension_semantics<parallel>, #tpu.dimension_semantics<parallel>], iteration_bounds = array<i64: 1, 1>, scalar_prefetch = 0 : i64, scratch_operands = 0 : i64, tpu.core_type = #tpu.core_type<tc>, window_params = [{transform_indices = @transform_0, window_bounds = array<i64: 2, 16, 8>}, {transform_indices = @transform_1, window_bounds = array<i64: 2, 16, 16>}, {pipeline_mode = #tpu.pipeline_mode<synchronous>, transform_indices = @transform_2, window_bounds = array<i64: 8, 128>}, {pipeline_mode = #tpu.pipeline_mode<synchronous>, transform_indices = @transform_3, window_bounds = array<i64: 1, 128>}, {transform_indices = @transform_4, window_bounds = array<i64: 2, 16, 128>}]} {
    %c0 = arith.constant 0 : index
    %c0_0 = arith.constant 0 : index
    %0 = vector.load %arg4[%c0, %c0_0] : memref<8x128xf32, #tpu.memory_space<vmem>>, vector<8x128xf32>
    %c0_1 = arith.constant 0 : index
    %c0_2 = arith.constant 0 : index
    %1 = vector.load %arg5[%c0_1, %c0_2] : memref<1x128xf32, #tpu.memory_space<vmem>>, vector<1x128xf32>
    %c0_3 = arith.constant 0 : index
    %c0_4 = arith.constant 0 : index
    %c0_5 = arith.constant 0 : index
    %2 = vector.load %arg3[%c0_3, %c0_4, %c0_5] : memref<2x16x16xf32, #tpu.memory_space<vmem>>, vector<1x16x16xf32>
    %3 = vector.shape_cast %2 : vector<1x16x16xf32> to vector<16x16xf32>
    %c0_6 = arith.constant 0 : index
    %c0_7 = arith.constant 0 : index
    %c0_8 = arith.constant 0 : index
    %4 = vector.load %arg2[%c0_6, %c0_7, %c0_8] : memref<2x16x8xf32, #tpu.memory_space<vmem>>, vector<1x16x8xf32>
    %5 = vector.shape_cast %4 : vector<1x16x8xf32> to vector<16x8xf32>
    %cst = arith.constant dense<0.000000e+00> : vector<16x8xf32>
    %6 = tpu.matmul %3, %5, %cst {dimension_numbers = #tpu.dot_dimension_numbers<[1], [0], [0], [1], [0, 0, 1, 1], [], []>} : vector<16x16xf32>, vector<16x8xf32>, vector<16x8xf32> -> vector<16x8xf32>
    %cst_9 = arith.constant dense<0.000000e+00> : vector<16x128xf32>
    %7 = tpu.matmul %6, %0, %cst_9 {dimension_numbers = #tpu.dot_dimension_numbers<[1], [0], [0], [1], [0, 0, 1, 1], [], []>} : vector<16x8xf32>, vector<8x128xf32>, vector<16x128xf32> -> vector<16x128xf32>
    %8 = vector.broadcast %1 : vector<1x128xf32> to vector<16x128xf32>
    %9 = arith.addf %7, %8 : vector<16x128xf32>
    %cst_10 = arith.constant 0.000000e+00 : f32
    %10 = vector.broadcast %cst_10 : f32 to vector<16x128xf32>
    %11 = arith.maximumf %9, %10 : vector<16x128xf32>
    %c0_11 = arith.constant 0 : index
    %c0_12 = arith.constant 0 : index
    %c0_13 = arith.constant 0 : index
    %12 = vector.load %arg6[%c0_11, %c0_12, %c0_13] : memref<2x16x128xf32, #tpu.memory_space<vmem>>, vector<1x16x128xf32>
    %13 = vector.shape_cast %12 : vector<1x16x128xf32> to vector<16x128xf32>
    %14 = vector.shape_cast %11 : vector<16x128xf32> to vector<1x16x128xf32>
    tpu.vector_store %arg6[%c0_11, %c0_12, %c0_13], %14 {strides = array<i32>} : memref<2x16x128xf32, #tpu.memory_space<vmem>>, vector<1x16x128xf32>,
    %c1 = arith.constant 1 : index
    %c0_14 = arith.constant 0 : index
    %c0_15 = arith.constant 0 : index
    %15 = vector.load %arg3[%c1, %c0_14, %c0_15] : memref<2x16x16xf32, #tpu.memory_space<vmem>>, vector<1x16x16xf32>
    %16 = vector.shape_cast %15 : vector<1x16x16xf32> to vector<16x16xf32>
    %c1_16 = arith.constant 1 : index
    %c0_17 = arith.constant 0 : index
    %c0_18 = arith.constant 0 : index
    %17 = vector.load %arg2[%c1_16, %c0_17, %c0_18] : memref<2x16x8xf32, #tpu.memory_space<vmem>>, vector<1x16x8xf32>
    %18 = vector.shape_cast %17 : vector<1x16x8xf32> to vector<16x8xf32>
    %cst_19 = arith.constant dense<0.000000e+00> : vector<16x8xf32>
    %19 = tpu.matmul %16, %18, %cst_19 {dimension_numbers = #tpu.dot_dimension_numbers<[1], [0], [0], [1], [0, 0, 1, 1], [], []>} : vector<16x16xf32>, vector<16x8xf32>, vector<16x8xf32> -> vector<16x8xf32>
    %cst_20 = arith.constant dense<0.000000e+00> : vector<16x128xf32>
    %20 = tpu.matmul %19, %0, %cst_20 {dimension_numbers = #tpu.dot_dimension_numbers<[1], [0], [0], [1], [0, 0, 1, 1], [], []>} : vector<16x8xf32>, vector<8x128xf32>, vector<16x128xf32> -> vector<16x128xf32>
    %21 = vector.broadcast %1 : vector<1x128xf32> to vector<16x128xf32>
    %22 = arith.addf %20, %21 : vector<16x128xf32>
    %cst_21 = arith.constant 0.000000e+00 : f32
    %23 = vector.broadcast %cst_21 : f32 to vector<16x128xf32>
    %24 = arith.maximumf %22, %23 : vector<16x128xf32>
    %c1_22 = arith.constant 1 : index
    %c0_23 = arith.constant 0 : index
    %c0_24 = arith.constant 0 : index
    %25 = vector.load %arg6[%c1_22, %c0_23, %c0_24] : memref<2x16x128xf32, #tpu.memory_space<vmem>>, vector<1x16x128xf32>
    %26 = vector.shape_cast %25 : vector<1x16x128xf32> to vector<16x128xf32>
    %27 = vector.shape_cast %24 : vector<16x128xf32> to vector<1x16x128xf32>
    tpu.vector_store %arg6[%c1_22, %c0_23, %c0_24], %27 {strides = array<i32>} : memref<2x16x128xf32, #tpu.memory_space<vmem>>, vector<1x16x128xf32>,
    return
  }
  func.func @transform_0(%arg0: i32, %arg1: i32) -> (i32, i32, i32) {
    %c0_i32 = arith.constant 0 : i32
    %c0_i32_0 = arith.constant 0 : i32
    %c0_i32_1 = arith.constant 0 : i32
    return %arg0, %c0_i32, %c0_i32_0 : i32, i32, i32
  }
  func.func @transform_1(%arg0: i32, %arg1: i32) -> (i32, i32, i32) {
    %c0_i32 = arith.constant 0 : i32
    %c0_i32_0 = arith.constant 0 : i32
    return %arg0, %arg1, %c0_i32 : i32, i32, i32
  }
  func.func @transform_2(%arg0: i32, %arg1: i32) -> (i32, i32) {
    %c0_i32 = arith.constant 0 : i32
    %c0_i32_0 = arith.constant 0 : i32
    %c0_i32_1 = arith.constant 0 : i32
    return %c0_i32, %c0_i32_0 : i32, i32
  }
  func.func @transform_3(%arg0: i32, %arg1: i32) -> (i32, i32) {
    %c0_i32 = arith.constant 0 : i32
    %c0_i32_0 = arith.constant 0 : i32
    %c0_i32_1 = arith.constant 0 : i32
    return %c0_i32, %c0_i32_0 : i32, i32
  }
  func.func @transform_4(%arg0: i32, %arg1: i32) -> (i32, i32, i32) {
    %c0_i32 = arith.constant 0 : i32
    %c0_i32_0 = arith.constant 0 : i32
    return %arg0, %arg1, %c0_i32 : i32, i32, i32
  }
}

</mosaic_0001>

<bundles_post_ra>
// kernel: tpu_custom_call.1
= control target key start
LH: loop header
LB: loop body
LE: loop exit
PB: predicated region body
PF: predicated region fallthrough
CT: control target
= control target key end

     0   :  { %vm24_vm0 = vcmask 130048   ;;  %s551_s0 = inlined_call_operand.vmem [shape: f32[2,16,8], index: 0, kind: input, shape index: {}]   ;;  %s552_s1 = inlined_call_operand.vmem [shape: f32[2,16,16], index: 1, kind: input, shape index: {}]   ;;  %s553_s2 = inlined_call_operand.vmem [shape: f32[8,128], index: 2, kind: input, shape index: {}]   ;;  %s554_s3 = inlined_call_operand.vmem [shape: f32[1,128], index: 3, kind: input, shape index: {}]   ;;  %s555_s4 = inlined_call_operand.hbm [shape: f32[2,16,128], index: 4, kind: output, shape index: {}]  }
   0x1   :  { %v22_v0 = vld [vmem:[%s551_s0] sm:$0xff]  ;;  %v23_v1 = vld [vmem:[%s551_s0 + $0x8] sm:$0xff] }
   0x2   :  { %v20_v2 = vld [vmem:[%s552_s1] sm:$0xff]  ;;  %v438_v3 = vpack.c.bf16 %v23_v1, %v22_v0 }
   0x3   :  { %418 = vmatprep.mubr.msk.f32.mxu0 %vm24_vm0, %v20_v2 }
   0x4   :  { %9 = vsyncpa [#allocation3], 0  ;;  %439 = vmatprep.subr.bf16.mxu0 %v438_v3  ;;  %v21_v4 = vld [vmem:[%s552_s1 + $0x8] sm:$0xff]  ;;  %v18_v5 = vld [vmem:[%s553_s2] sm:$0xff]  ;;  %vm112_vm1 = vcmask 64512  }
   0x5   :  { %441 = vmatpush3.bf16.msra.mxu0 %v438_v3  ;;  %v394_v6 = vld [vmem:[%s551_s0 + $0x10] sm:$0xff]  ;;  %v395_v7 = vld [vmem:[%s551_s0 + $0x18] sm:$0xff]  ;;  %421 = vmatprep.subr.mxu1 %v18_v5  ;;  %v389_v13 = vld [vmem:[%s554_s3] ss:$0 sm:$0xff] }
   0x6   :  { %v442_v8 = vpack.c.bf16 %v395_v7, %v394_v6  ;;  %433 = vmatprep.subr.mxu0 %v18_v5  ;;  %422 = vmatpush3.msra.mxu1 %v18_v5  ;;  %v392_v11 = vld [vmem:[%s552_s1 + $0x10] sm:$0xff]  ;;  %v393_v12 = vld [vmem:[%s552_s1 + $0x18] sm:$0xff]  ;;  %s473_s1 = smov [#allocation2]  }
   0x7   :  { %s376_s7 = sshll.u32 %s473_s1, 4  ;;  %s377_s7 = int_to_ptr.vmem [resolvable:$true] %s376_s7 }
   0x8   :  { %419 = vmatmul.mubr.msk.f32.vlgmr.msra.gmra.mrb[0].mxu0 %vm24_vm0, %v21_v4  ;;  %443 = vmatprep.subr.bf16.mxu1 %v442_v8  ;;  %s449_s3 = scalar_lea.vmem %s377_s7, 512  ;;  %p454_p1 = scmp.lt.s32.totalorder %s377_s7, %s377_s7 }
   0x9   :  { %434 = vmatpush3.msra.mxu0 %v18_v5  ;;  %p450_p0 = scmp.ne.s32.totalorder %s377_s7, %s449_s3  ;;  %p455_p2 = scmp.lt.s32.totalorder %s449_s3, %s449_s3 }
   0xb   :  { %p456_p3 = por %p455_p2, %p454_p1 }
   0xd   :  { %p457_p4 = pnand %p456_p3, %p450_p0 }
  0xdb   :  { %v420_v9 = vpop.f32.mrb[0].mxu0 }
  0xdc   :  { %v97_v10 = vpop.f32.mrb[1].mxu0 }
  0xdd   :  { %423 = vmatprep.mubr.msk.f32.mxu1 %vm112_vm1, %v97_v10 }
  0xde   :  { %424 = vmatmul.mubr.msk.f32.vlgmr.msra.gmra.mrb[0].mxu1 %vm112_vm1, %v420_v9 }
  0xdf   :  { %445 = vmatpush3.bf16.msra.mxu1 %v442_v8  ;;  %430 = vmatprep.mubr.msk.f32.mxu1 %vm24_vm0, %v392_v11 }
  0xe2   :  { %431 = vmatmul.mubr.msk.f32.vlgmr.msra.gmra.mrb[2].mxu1 %vm24_vm0, %v393_v12 }
 0x1b1   :  { %v425_v14 = vpop.f32.mrb[0].mxu1 }
 0x1b2   :  { %v191_v15 = vadd.f32 %v425_v14, %v389_v13  ;;  %v185_v16 = vpop.f32.mrb[1].mxu1 }
 0x1b3   :  { %v186_v17 = vadd.f32 %v389_v13, %v185_v16 }
 0x1b4   :  { %v195_v18 = vmax.f32 %v191_v15, 0.0 }
 0x1b5   :  { %v194_v19 = vmax.f32 %v186_v17, 0.0  ;;  %v432_v20 = vpop.f32.mrb[2].mxu1 }
 0x1b6   :  { %197 = vst [vmem:[#allocation2 + $0x8] sm:$0xff] %v195_v18  ;;  %v276_v21 = vpop.f32.mrb[3].mxu1 }
 0x1b7   :  { %196 = vst [vmem:[#allocation2] sm:$0xff] %v194_v19  ;;  %435 = vmatprep.mubr.msk.f32.mxu0 %vm112_vm1, %v276_v21 }
 0x1b8   :  { %436 = vmatmul.mubr.msk.f32.vlgmr.msra.gmra.mrb[2].mxu0 %vm112_vm1, %v432_v20 }
 0x28b   :  { %v437_v22 = vpop.f32.mrb[2].mxu0 }
 0x28c   :  { %v363_v23 = vadd.f32 %v437_v22, %v389_v13  ;;  %v357_v24 = vpop.f32.mrb[3].mxu0 }
 0x28d   :  { %v358_v25 = vadd.f32 %v389_v13, %v357_v24 }
 0x28e   :  { %v367_v26 = vmax.f32 %v363_v23, 0.0 }
 0x28f   :  { %v366_v27 = vmax.f32 %v358_v25, 0.0 }
 0x290   :  { %370 = vst [vmem:[#allocation2 + $0x18] sm:$0xff] %v367_v26 }
 0x291   :  { %369 = vst [vmem:[#allocation2 + $0x10] sm:$0xff] %v366_v27 }
 0x292   :  { %460 = shalt.err (!%p457_p4)
}
 0x293   :  { %s461_s10 = scalar_lea.hbm %s555_s4, 512 }
 0x294   :  { %p462_p5 = scmp.ne.s32.totalorder %s555_s4, %s461_s10  ;;  %p465_p6 = scmp.lt.u32.totalorder %s461_s10, %s555_s4 }
 0x296   :  { %p467_p7 = pnand %p465_p6, %p462_p5 }
 0x298   :  { %470 = shalt.err (!%p467_p7)
}
 0x299   :  { %s474_s15 = smov 128   ;;  %s475_s16 = smov 8  }
 0x29a   :  { %382 = dma.vmem_to_hbm [thread:$0]  %s377_s7, 512, %s555_s4, [#allocation3], %s474_s15, %s474_s15, %s475_s16  }
 0x29b   :  { %471 = dma.done.wait [#allocation3], 512  }
 0x29c   :  { %472 = vsyncadd [#allocation3], 4294966784 }
 0x29d   :  { %386 = vsyncpa [#allocation3], 1 }

</bundles_post_ra>
